<compile_context>
chip_gen: v5e
topology: v5e:2x2
jax: 0.10.0
libtpu: 0.0.40
codegen_flags: <defaults>
</compile_context>

<pallas_src>
import jax
import jax.numpy as jnp
from jax import lax
from jax.experimental import pallas as pl
from jax.experimental.pallas import tpu as pltpu


LANE = 128
MAX_BLOCK_ROWS = 4096        # 4096 * 128 * 4 B = 2 MiB per f32 input block
MIN_SPLIT_ROWS = 32          # below this, a single full-array block is used
TARGET_BLOCKS = 4            # aim for >= 4 grid steps (pipeline + 2-TC on v7x)
PALLAS_MIN_ELEMS = 1 << 18   # below this, the fused-XLA path is faster


def _bce_with_logits(x, y):
    # Numerically-stable BCE with logits (matches torch semantics):
    #   loss = max(x, 0) - x*y + log(1 + exp(-|x|))
    # Exactly 2 transcendentals (exp, log1p) per element.
    return jnp.maximum(x, 0.0) - x * y + jnp.log1p(jnp.exp(-jnp.abs(x)))


def _choose_block_rows(rows):
    if rows <= MIN_SPLIT_ROWS:
        return rows                          # single block == full array dims
    br = (rows + TARGET_BLOCKS - 1) // TARGET_BLOCKS
    br = ((br + 31) // 32) * 32              # multiple of 32 rows: f32/bf16/int8 friendly
    return min(MAX_BLOCK_ROWS, br)


def _make_partial_sum_kernel(rows_full, block_rows, num_blocks):
    # Only the last grid block can run past the end of the (rows_full, 128)
    # slab; mask rows there.  Compiled out entirely when block_rows | rows_full.
    partial_last = (rows_full % block_rows) != 0

    def kernel(x_ref, y_ref, o_ref):
        x = x_ref[...].astype(jnp.float32)   # bf16 or f32 logits
        y = y_ref[...].astype(jnp.float32)   # f32/bf16 soft or int8/bool hard labels
        loss = _bce_with_logits(x, y)
        # NOTE: jnp.sum over axis 0 accumulates vreg-by-vreg into an (8,128)
        # accumulator plus one final cross-sublane reduce; fine while the
        # kernel stays HBM-bound (chunked fori_loop accumulation only if the
        # bundle dump shows an extra vst/vld pass).

        def _store(l):
            o_ref[...] = jnp.sum(l, axis=0).reshape(1, 1, LANE)

        if partial_last:
            i = pl.program_id(0)

            @pl.when(i == num_blocks - 1)
            def _():
                row_ids = lax.broadcasted_iota(jnp.int32, loss.shape, 0)
                valid = (i * block_rows + row_ids) < rows_full
                # where() BEFORE the sum: out-of-range rows may hold Inf/NaN.
                _store(jnp.where(valid, loss, 0.0))

            @pl.when(i != num_blocks - 1)
            def _():
                _store(loss)
        else:
            _store(loss)

    return kernel


def focal_loss(x, y, alpha=1.0, gamma=0.3, use_pallas=None):
    """JAX/Pallas equivalent of FocalLoss.forward(x, y). Returns an f32 scalar.

    x: logits (f32 or bf16).  y: targets (f32/bf16 soft labels, or int8/bool
    hard 0/1 labels -> 1 B/elem HBM traffic).  use_pallas: None = auto
    (Pallas only for >= 256K elements), True/False to force.
    """
    total_n = x.size
    assert y.size == total_n
    if use_pallas is None:
        use_pallas = total_n >= PALLAS_MIN_ELEMS

    rows_full = total_n // LANE

    if (not use_pallas) or rows_full == 0:
        # Fused-XLA path: strictly faster for tiny inputs.
        xf = jnp.ravel(x).astype(jnp.float32)
        yf = jnp.ravel(y).astype(jnp.float32)
        total = jnp.sum(_bce_with_logits(xf, yf))
    else:
        xf = jnp.ravel(x)
        yf = jnp.ravel(y)
        aligned = rows_full * LANE
        # Prefix slice + reshape: a no-op view when total_n % 128 == 0 (the
        # common case); no full-tensor pad copy on ragged sizes.
        x2d = xf[:aligned].reshape(rows_full, LANE)
        y2d = yf[:aligned].reshape(rows_full, LANE)

        block_rows = _choose_block_rows(rows_full)
        num_blocks = (rows_full + block_rows - 1) // block_rows

        partials = pl.pallas_call(
            _make_partial_sum_kernel(rows_full, block_rows, num_blocks),
            out_shape=jax.ShapeDtypeStruct((num_blocks, 1, LANE), jnp.float32),
            grid_spec=pltpu.PrefetchScalarGridSpec(
                num_scalar_prefetch=0,
                grid=(num_blocks,),
                in_specs=[
                    pl.BlockSpec((block_rows, LANE), lambda i: (i, 0)),
                    pl.BlockSpec((block_rows, LANE), lambda i: (i, 0)),
                ],
                out_specs=pl.BlockSpec((1, 1, LANE), lambda i: (i, 0, 0)),
            ),
            compiler_params=pltpu.CompilerParams(
                # Independent per-block partial sums -> true parallel axis;
                # shards across both TensorCores on v7x and lets the BlockSpec
                # pipeline overlap DMA with VPU/EUP work.
                dimension_semantics=("parallel",),
            ),
        )(x2d, y2d)

        total = jnp.sum(partials)

        tail = total_n - aligned
        if tail:  # < 128 elements: cheap plain-JAX epilogue instead of in-kernel masking
            xt = xf[aligned:].astype(jnp.float32)
            yt = yf[aligned:].astype(jnp.float32)
            total = total + jnp.sum(_bce_with_logits(xt, yt))

    # Mean + focal transform (tiny scalar epilogue).  f32 division by the
    # element count rounds only for total_n > 2^24 (~1e-7 rel err), same as
    # any f32 mean.
    ce = total / total_n
    fc = alpha * (1.0 - jnp.exp(-ce)) ** gamma * ce
    return fc


def _reference_focal_loss(x, y, alpha=1.0, gamma=0.3):
    xf = jnp.ravel(x).astype(jnp.float32)
    yf = jnp.ravel(y).astype(jnp.float32)
    ce = jnp.mean(_bce_with_logits(xf, yf))
    return alpha * (1.0 - jnp.exp(-ce)) ** gamma * ce


if __name__ == "__main__":
    key = jax.random.PRNGKey(0)
    k1, k2, k3, k4 = jax.random.split(key, 4)

    # Test 1: the module's canonical small NCHW shape, exact f32 semantics
    # (128-aligned -> no slice/pad, single full-array block).
    x1 = jax.random.normal(k1, (2, 4, 16, 16), dtype=jnp.float32)
    y1 = (jax.random.uniform(k2, (2, 4, 16, 16)) > 0.5).astype(jnp.float32)
    out1 = jax.block_until_ready(focal_loss(x1, y1, alpha=1.0, gamma=0.3, use_pallas=True))
    ref1 = _reference_focal_loss(x1, y1)
    assert jnp.allclose(out1, ref1, rtol=5e-5, atol=1e-6), (out1, ref1)

    # Test 2: ragged total (2*3*40*67 = 16080, not a multiple of 128), 4-block
    # grid with a partial last block + tail epilogue, int8 hard labels.
    x2 = jax.random.normal(k3, (2, 3, 40, 67), dtype=jnp.float32)
    y2 = (jax.random.uniform(k4, (2, 3, 40, 67)) > 0.5).astype(jnp.int8)
    out2 = jax.block_until_ready(focal_loss(x2, y2, alpha=1.0, gamma=0.3, use_pallas=True))
    ref2 = _reference_focal_loss(x2, y2)
    assert jnp.allclose(out2, ref2, rtol=5e-5, atol=1e-6), (out2, ref2)

    print("KERNEL_OK")
</pallas_src>

<mosaic_0001>
module attributes {stable_mosaic.version = 11 : i64} {
  func.func @kernel(%arg0: i32, %arg1: memref<16x128xf32, #tpu.memory_space<vmem>>, %arg2: memref<16x128xf32, #tpu.memory_space<vmem>>, %arg3: memref<1x1x128xf32, #tpu.memory_space<vmem>>) attributes {dimension_semantics = [#tpu.dimension_semantics<parallel>], iteration_bounds = array<i64: 1>, scalar_prefetch = 0 : i64, scratch_operands = 0 : i64, tpu.core_type = #tpu.core_type<tc>, window_params = [{transform_indices = @transform_0, window_bounds = array<i64: 16, 128>}, {transform_indices = @transform_1, window_bounds = array<i64: 16, 128>}, {transform_indices = @transform_2, window_bounds = array<i64: 1, 1, 128>}]} {
    %c0 = arith.constant 0 : index
    %c0_0 = arith.constant 0 : index
    %0 = vector.load %arg1[%c0, %c0_0] : memref<16x128xf32, #tpu.memory_space<vmem>>, vector<16x128xf32>
    %c0_1 = arith.constant 0 : index
    %c0_2 = arith.constant 0 : index
    %1 = vector.load %arg2[%c0_1, %c0_2] : memref<16x128xf32, #tpu.memory_space<vmem>>, vector<16x128xf32>
    %cst = arith.constant 0.000000e+00 : f32
    %2 = vector.broadcast %cst : f32 to vector<16x128xf32>
    %3 = arith.maximumf %0, %2 : vector<16x128xf32>
    %4 = arith.mulf %0, %1 : vector<16x128xf32>
    %5 = arith.subf %3, %4 : vector<16x128xf32>
    %6 = math.absf %0 : vector<16x128xf32>
    %cst_3 = arith.constant 0.000000e+00 : f32
    %7 = vector.broadcast %cst_3 : f32 to vector<16x128xf32>
    %8 = arith.subf %7, %6 : vector<16x128xf32>
    %9 = math.exp %8 : vector<16x128xf32>
    %10 = math.log1p %9 : vector<16x128xf32>
    %11 = arith.addf %5, %10 : vector<16x128xf32>
    %cst_4 = arith.constant dense<0.000000e+00> : vector<128xf32>
    %12 = vector.multi_reduction <add>, %11, %cst_4 [0] : vector<16x128xf32> to vector<128xf32>
    %13 = vector.shape_cast %12 : vector<128xf32> to vector<1x1x128xf32>
    %c0_5 = arith.constant 0 : index
    %c0_6 = arith.constant 0 : index
    %c0_7 = arith.constant 0 : index
    %14 = vector.load %arg3[%c0_5, %c0_6, %c0_7] : memref<1x1x128xf32, #tpu.memory_space<vmem>>, vector<1x1x128xf32>
    tpu.vector_store %arg3[%c0_5, %c0_6, %c0_7], %13 {strides = array<i32>} : memref<1x1x128xf32, #tpu.memory_space<vmem>>, vector<1x1x128xf32>,
    return
  }
  func.func @transform_0(%arg0: i32) -> (i32, i32) {
    %c0_i32 = arith.constant 0 : i32
    %c0_i32_0 = arith.constant 0 : i32
    return %arg0, %c0_i32 : i32, i32
  }
  func.func @transform_1(%arg0: i32) -> (i32, i32) {
    %c0_i32 = arith.constant 0 : i32
    %c0_i32_0 = arith.constant 0 : i32
    return %arg0, %c0_i32 : i32, i32
  }
  func.func @transform_2(%arg0: i32) -> (i32, i32, i32) {
    %c0_i32 = arith.constant 0 : i32
    %c0_i32_0 = arith.constant 0 : i32
    %c0_i32_1 = arith.constant 0 : i32
    return %arg0, %c0_i32, %c0_i32_0 : i32, i32, i32
  }
}

</mosaic_0001>

<bundles_post_ra>
// kernel: tpu_custom_call.1
= control target key start
LH: loop header
LB: loop body
LE: loop exit
PB: predicated region body
PF: predicated region fallthrough
CT: control target
= control target key end

     0   :  { %7 = vsyncpa [#allocation3], 0  ;;  %s228_s0 = inlined_call_operand.hbm [shape: f32[16,128], index: 0, kind: input, shape index: {}]   ;;  %s229_s1 = inlined_call_operand.hbm [shape: f32[16,128], index: 1, kind: input, shape index: {}]   ;;  %s230_s2 = inlined_call_operand.hbm [shape: f32[1,1,128], index: 2, kind: output, shape index: {}]  }
   0x1   :  { %8 = vsyncpa [#allocation6], 0 }
   0x2   :  { %9 = vsyncpa [#allocation4], 0  ;;  %s14_s11 = sshll.u32 %s228_s0, 4  ;;  %s199_s12 = smov [#allocation2]   ;;  %s15_s11 = int_to_ptr.hbm [resolvable:$true] %s14_s11 }
   0x3   :  { %s16_s13 = sshll.u32 %s199_s12, 4  ;;  %s27_s16 = sshll.u32 %s229_s1, 4  ;;  %s17_s13 = int_to_ptr.vmem [resolvable:$true] %s16_s13  ;;  %s28_s16 = int_to_ptr.hbm [resolvable:$true] %s27_s16 }
   0x4   :  { %s200_s17 = smov 128   ;;  %s201_s18 = smov 8  }
   0x5   :  { %22 = dma.hbm_to_vmem [thread:$0]  %s15_s11, 256, %s17_s13, [#allocation3], %s200_s17, %s200_s17, %s201_s18  }
   0x6   :  { %s202_s19 = smov [#allocation5]  }
   0x7   :  { %s29_s20 = sshll.u32 %s202_s19, 4  ;;  %s30_s20 = int_to_ptr.vmem [resolvable:$true] %s29_s20 }
   0x8   :  { %35 = dma.hbm_to_vmem [thread:$0]  %s28_s16, 256, %s30_s20, [#allocation6], %s200_s17, %s200_s17, %s201_s18  }
   0x9   :  { %193 = dma.done.wait [#allocation3], 256  }
   0xa   :  { %194 = vsyncadd [#allocation3], 4294967040 }
   0xb   :  { %195 = dma.done.wait [#allocation6], 256  }
   0xc   :  { %196 = vsyncadd [#allocation6], 4294967040  ;;  %v44_v0 = vld [vmem:[#allocation2] sm:$0xff]  ;;  %v45_v1 = vld [vmem:[#allocation2 + $0x8] sm:$0xff]  ;;  %s203_s0 = smov [#allocation7]   ;;  %s97_s23 = sshll.u32 %s230_s2, 4  ;;  %s98_s23 = int_to_ptr.hbm [resolvable:$true] %s97_s23 }
   0xd   :  { %v54_v2 = vand.u32 2147483647, %v44_v0  ;;  %v55_v3 = vand.u32 2147483647, %v45_v1  ;;  %v46_v12 = vld [vmem:[#allocation5] sm:$0xff]  ;;  %v47_v15 = vld [vmem:[#allocation5 + $0x8] sm:$0xff] }
   0xe   :  { %v48_v17 = vmax.f32 %v44_v0, 0.0  ;;  %v50_v18 = vmul.f32 %v46_v12, %v44_v0  ;;  %v49_v21 = vmax.f32 %v45_v1, 0.0  ;;  %v51_v22 = vmul.f32 %v47_v15, %v45_v1  ;;  %s95_s1 = sshll.u32 %s203_s0, 4  ;;  %s96_s1 = int_to_ptr.vmem [resolvable:$true] %s95_s1 }
   0xf   :  { %v56_v4 = vsub.f32 0.0, %v54_v2  ;;  %v57_v5 = vsub.f32 0.0, %v55_v3 }
  0x10   :  { %v52_v26 = vsub.f32 %v48_v17, %v50_v18  ;;  %v53_v29 = vsub.f32 %v49_v21, %v51_v22 }
  0x11   :  { %v58_v6 = vmul.f32 1.442695, %v56_v4  ;;  %v60_v7 = vmul.f32 1.442695, %v57_v5 }
  0x13   :  { %113 = vpow2.f32 %v58_v6 }
  0x14   :  { %115 = vpow2.f32 %v60_v7 }
  0x19   :  { %v114_v8 = vpop.eup %113 }
  0x1a   :  { %v116_v9 = vpop.eup %115  ;;  %v62_v10 = vadd.f32 1.0, %v114_v8  ;;  %v65_v11 = vmul.f32 -0.5, %v114_v8  ;;  %v68_v19 = vand.u32 2147483647, %v114_v8 }
  0x1b   :  { %v71_v13 = vadd.f32 1.0, %v116_v9  ;;  %v74_v14 = vmul.f32 -0.5, %v116_v9  ;;  %v77_v23 = vand.u32 2147483647, %v116_v9 }
  0x1c   :  { %117 = vlog2.f32 %v62_v10  ;;  %v66_v16 = vadd.f32 1.0, %v65_v11  ;;  %vm69_vm0 = vcmp.lt.f32.partialorder %v68_v19, 0.0004427343 }
  0x1d   :  { %119 = vlog2.f32 %v71_v13  ;;  %v75_v20 = vadd.f32 1.0, %v74_v14  ;;  %vm78_vm1 = vcmp.lt.f32.partialorder %v77_v23, 0.0004427343 }
  0x1e   :  { %v67_v24 = vmul.f32 %v114_v8, %v66_v16 }
  0x1f   :  { %v76_v27 = vmul.f32 %v116_v9, %v75_v20 }
  0x22   :  { %v118_v25 = vpop.eup %117 }
  0x23   :  { %v120_v28 = vpop.eup %119  ;;  %v64_v30 = vmul.f32 0.6931472, %v118_v25 }
  0x24   :  { %v73_v31 = vmul.f32 0.6931472, %v120_v28 }
  0x25   :  { %v70_v32 = vsel %vm69_vm0, %v67_v24, %v64_v30 }
  0x26   :  { %v79_v33 = vsel %vm78_vm1, %v76_v27, %v73_v31  ;;  %v80_v34 = vadd.f32 %v70_v32, %v52_v26 }
  0x27   :  { %v81_v35 = vadd.f32 %v79_v33, %v53_v29 }
  0x29   :  { %v82_v36 = vadd.f32 %v81_v35, %v80_v34 }
  0x2b   :  { %v83_v37 = vrot.slane %v82_v36, 4 }
  0x2d   :  { %v84_v38 = vadd.f32 %v83_v37, %v82_v36 }
  0x2f   :  { %v85_v39 = vrot.slane %v84_v38, 2 }
  0x31   :  { %v86_v40 = vadd.f32 %v85_v39, %v84_v38 }
  0x33   :  { %v87_v41 = vrot.slane %v86_v40, 1 }
  0x35   :  { %v88_v42 = vadd.f32 %v87_v41, %v86_v40 }
  0x37   :  { %89 = vst [vmem:[#allocation7] sm:$0x1] %v88_v42 }
  0x38   :  { %100 = dma.vmem_to_hbm [thread:$0]  %s96_s1, 16, %s98_s23, [#allocation4]  }
  0x39   :  { %197 = dma.done.wait [#allocation4], 16  }
  0x3a   :  { %198 = vsyncadd [#allocation4], 4294967280 }
  0x3b   :  { %105 = vsyncpa [#allocation3], 1 }
  0x3c   :  { %106 = vsyncpa [#allocation6], 1 }
  0x3d   :  { %107 = vsyncpa [#allocation4], 1 }

</bundles_post_ra>
